<compile_context>
chip_gen: v6e
topology: v6e:2x2x1
jax: 0.10.0
libtpu: 0.0.40
codegen_flags: <defaults>
</compile_context>

<pallas_src>
import functools
import math

import jax
import jax.numpy as jnp
from jax import lax
from jax.experimental import pallas as pl
from jax.experimental.pallas import tpu as pltpu


def _round_up(x, m):
    return (x + m - 1) // m * m


def _mmd_kernel(zr_ref, zc_ref, out_ref, acc_ref, *, gammas, n1, n2, tile):
    i = pl.program_id(0)
    j = pl.program_id(1)

    @pl.when(j == 0)
    def _():
        acc_ref[...] = jnp.zeros_like(acc_ref)

    zi = zr_ref[...]  # (tile, d) f32, rows of z for this row-block
    zj = zc_ref[...]  # (tile, d) f32, rows of z for this col-block

    # Pairwise squared distances via the matmul identity (MXU path).
    sq_i = jnp.sum(zi * zi, axis=1, keepdims=True)  # (tile, 1)
    ones_row = jnp.ones((1, zj.shape[1]), jnp.float32)
    sq_j_t = lax.dot_general(  # (1, tile): row vector of ||z_j||^2
        ones_row, zj * zj, (((1,), (1,)), ((), ())),
        preferred_element_type=jnp.float32)
    cross = lax.dot_general(  # (tile, tile): zi @ zj^T
        zi, zj, (((1,), (1,)), ((), ())),
        preferred_element_type=jnp.float32)
    dist = jnp.maximum(sq_i + sq_j_t - 2.0 * cross, 0.0)

    # Sum of RBF kernels over all bandwidths (static unrolled loop).
    ksum = jnp.zeros_like(dist)
    for g in gammas:
        ksum = ksum + jnp.exp((-g) * dist)
    ksum = ksum * (1.0 / len(gammas))

    # Signed weights: +1/n1 for x1 rows, -1/n2 for x2 rows, 0 for padding.
    n = n1 + n2
    inv_n1 = 1.0 / n1
    inv_n2 = 1.0 / n2
    row_idx = i * tile + lax.broadcasted_iota(jnp.int32, (tile, 1), 0)
    col_idx = j * tile + lax.broadcasted_iota(jnp.int32, (1, tile), 1)
    w_r = jnp.where(row_idx < n1, inv_n1,
                    jnp.where(row_idx < n, -inv_n2, 0.0)).astype(jnp.float32)
    w_c = jnp.where(col_idx < n1, inv_n1,
                    jnp.where(col_idx < n, -inv_n2, 0.0)).astype(jnp.float32)

    val = (w_r * ksum) * w_c  # (tile, tile) weighted kernel values

    # Fold the tile down to one lane-dense (8, 128) partial-sum slab using
    # vreg-aligned static slices (cheap VPU adds, no masked/partial stores).
    folded = val[:, 0:128]
    for c in range(1, tile // 128):
        folded = folded + val[:, c * 128:(c + 1) * 128]  # (tile, 128)
    part = folded[0:8, :]
    for r in range(1, tile // 8):
        part = part + folded[r * 8:(r + 1) * 8, :]  # (8, 128)

    acc_ref[...] += part

    @pl.when(j == pl.num_programs(1) - 1)
    def _():
        out_ref[...] = acc_ref[...]


def mmd_loss(x1, x2, bandwidths):
    """Pallas MMD loss. x1: (n1, d), x2: (n2, d); returns a scalar."""
    x1 = jnp.asarray(x1, jnp.float32)
    x2 = jnp.asarray(x2, jnp.float32)
    n1, d1 = x1.shape
    n2, d2 = x2.shape
    assert d1 == d2, "x1 and x2 must share the feature dimension"
    d = d1

    # gamma_b = sqrt(d) / (2 * bandwidth_b^2), identical for all three terms.
    gammas = tuple(float(math.sqrt(d) / (2.0 * float(b) ** 2))
                   for b in bandwidths)

    n = n1 + n2
    # Large tiles amortize the ~0.35us/step grid overhead; 128 keeps >=2
    # parallel row-blocks (second TensorCore on v7x) for mid-sized inputs.
    tile = 256 if n > 512 else 128
    n_pad = max(tile, _round_up(n, tile))
    n_blocks = n_pad // tile

    z = jnp.concatenate([x1, x2], axis=0)
    z = jnp.pad(z, ((0, n_pad - n), (0, 0)))  # explicit zero padding, weight 0

    kernel = functools.partial(
        _mmd_kernel, gammas=gammas, n1=n1, n2=n2, tile=tile)

    partial_slabs = pl.pallas_call(
        kernel,
        out_shape=jax.ShapeDtypeStruct((n_blocks * 8, 128), jnp.float32),
        grid_spec=pltpu.PrefetchScalarGridSpec(
            num_scalar_prefetch=0,
            grid=(n_blocks, n_blocks),
            in_specs=[
                pl.BlockSpec((tile, d), lambda i, j: (i, 0)),  # row block of z
                pl.BlockSpec((tile, d), lambda i, j: (j, 0)),  # col block of z
            ],
            out_specs=pl.BlockSpec((8, 128), lambda i, j: (i, 0)),
            scratch_shapes=[pltpu.VMEM((8, 128), jnp.float32)],
        ),
        compiler_params=pltpu.CompilerParams(
            dimension_semantics=("parallel", "arbitrary")),
    )(z, z)

    # Tiny scalar epilogue (global sum over per-row-block slabs + sqrt).
    mmd_sq = jnp.sum(partial_slabs)
    return jnp.sqrt(jnp.maximum(mmd_sq, 0.0))


# ---------------------------------------------------------------------------
# Pure-JAX reference mirroring the PyTorch module exactly.
# ---------------------------------------------------------------------------
def _K_ref(xa, xb, gamma):
    diff = xa[:, None, :] - xb[None, :, :]
    return jnp.exp(-gamma * jnp.sum(diff * diff, axis=2))


def mmd_loss_reference(x1, x2, bandwidths):
    d1 = x1.shape[1]
    d2 = x2.shape[1]
    L = len(bandwidths)
    bws = [1.0 / (2.0 * float(b) ** 2) for b in bandwidths]
    k11 = 0.0
    k12 = 0.0
    k22 = 0.0
    for bw in bws:
        k11 = k11 + _K_ref(x1, x1, math.sqrt(d1) * bw) / L
        k22 = k22 + _K_ref(x2, x2, math.sqrt(d2) * bw) / L
        k12 = k12 + _K_ref(x1, x2, math.sqrt(d1) * bw) / L
    return jnp.sqrt(jnp.mean(k11) - 2.0 * jnp.mean(k12) + jnp.mean(k22))


if __name__ == "__main__":
    n1, n2, d = 96, 96, 16
    bandwidths = [1.0, 2.0, 5.0, 10.0]

    key = jax.random.PRNGKey(0)
    k1, k2 = jax.random.split(key)
    x1 = jax.random.normal(k1, (n1, d), dtype=jnp.float32)
    x2 = jax.random.normal(k2, (n2, d), dtype=jnp.float32) + 0.5

    out = mmd_loss(x1, x2, bandwidths)
    out = jax.block_until_ready(out)

    ref = mmd_loss_reference(x1, x2, bandwidths)
    assert out.shape == (), out.shape
    assert bool(jnp.isfinite(out)), float(out)
    assert jnp.allclose(out, ref, rtol=1e-4, atol=1e-4), (float(out), float(ref))

    print("KERNEL_OK")
</pallas_src>

<mosaic_0001>
module attributes {stable_mosaic.version = 11 : i64} {
  func.func @_mmd_kernel(%arg0: i32, %arg1: i32, %arg2: memref<128x16xf32, #tpu.memory_space<vmem>>, %arg3: memref<128x16xf32, #tpu.memory_space<vmem>>, %arg4: memref<8x128xf32, #tpu.memory_space<vmem>>, %arg5: memref<8x128xf32, #tpu.memory_space<vmem>>) attributes {dimension_semantics = [#tpu.dimension_semantics<parallel>, #tpu.dimension_semantics<arbitrary>], iteration_bounds = array<i64: 2, 2>, scalar_prefetch = 0 : i64, scratch_operands = 1 : i64, tpu.core_type = #tpu.core_type<tc>, window_params = [{transform_indices = @transform_0, window_bounds = array<i64: 128, 16>}, {transform_indices = @transform_1, window_bounds = array<i64: 128, 16>}, {transform_indices = @transform_2, window_bounds = array<i64: 8, 128>}]} {
    %c0_i32 = arith.constant 0 : i32
    %0 = arith.cmpi eq, %arg1, %c0_i32 : i32
    %1 = arith.extui %0 : i1 to i32
    %c0_i32_0 = arith.constant 0 : i32
    %2 = arith.cmpi ne, %1, %c0_i32_0 : i32
    scf.if %2 {
      %cst_29 = arith.constant 0.000000e+00 : f32
      %106 = vector.broadcast %cst_29 : f32 to vector<8x128xf32>
      %c0_30 = arith.constant 0 : index
      %c0_31 = arith.constant 0 : index
      %107 = vector.load %arg5[%c0_30, %c0_31] : memref<8x128xf32, #tpu.memory_space<vmem>>, vector<8x128xf32>
      tpu.vector_store %arg5[%c0_30, %c0_31], %106 {strides = array<i32>} : memref<8x128xf32, #tpu.memory_space<vmem>>, vector<8x128xf32>,
    } else {
    }
    %c0 = arith.constant 0 : index
    %c0_1 = arith.constant 0 : index
    %3 = vector.load %arg2[%c0, %c0_1] : memref<128x16xf32, #tpu.memory_space<vmem>>, vector<128x16xf32>
    %c0_2 = arith.constant 0 : index
    %c0_3 = arith.constant 0 : index
    %4 = vector.load %arg3[%c0_2, %c0_3] : memref<128x16xf32, #tpu.memory_space<vmem>>, vector<128x16xf32>
    %5 = arith.mulf %3, %3 : vector<128x16xf32>
    %cst = arith.constant dense<0.000000e+00> : vector<128xf32>
    %6 = vector.multi_reduction <add>, %5, %cst [1] : vector<128x16xf32> to vector<128xf32>
    %7 = vector.shape_cast %6 : vector<128xf32> to vector<128x1xf32>
    %cst_4 = arith.constant 1.000000e+00 : f32
    %8 = vector.broadcast %cst_4 : f32 to vector<1x16xf32>
    %9 = arith.mulf %4, %4 : vector<128x16xf32>
    %cst_5 = arith.constant dense<0.000000e+00> : vector<1x128xf32>
    %10 = tpu.matmul %8, %9, %cst_5 {dimension_numbers = #tpu.dot_dimension_numbers<[1], [1], [0], [0], [0, 0, 1, 0], [], []>} : vector<1x16xf32>, vector<128x16xf32>, vector<1x128xf32> -> vector<1x128xf32>
    %cst_6 = arith.constant dense<0.000000e+00> : vector<128x128xf32>
    %11 = tpu.matmul %3, %4, %cst_6 {dimension_numbers = #tpu.dot_dimension_numbers<[1], [1], [0], [0], [0, 0, 1, 0], [], []>} : vector<128x16xf32>, vector<128x16xf32>, vector<128x128xf32> -> vector<128x128xf32>
    %12 = vector.broadcast %7 : vector<128x1xf32> to vector<128x128xf32>
    %13 = vector.broadcast %10 : vector<1x128xf32> to vector<128x128xf32>
    %14 = arith.addf %12, %13 : vector<128x128xf32>
    %cst_7 = arith.constant 2.000000e+00 : f32
    %15 = vector.broadcast %cst_7 : f32 to vector<128x128xf32>
    %16 = arith.mulf %15, %11 : vector<128x128xf32>
    %17 = arith.subf %14, %16 : vector<128x128xf32>
    %cst_8 = arith.constant 0.000000e+00 : f32
    %18 = vector.broadcast %cst_8 : f32 to vector<128x128xf32>
    %19 = arith.maximumf %17, %18 : vector<128x128xf32>
    %cst_9 = arith.constant 0.000000e+00 : f32
    %20 = vector.broadcast %cst_9 : f32 to vector<128x128xf32>
    %cst_10 = arith.constant -2.000000e+00 : f32
    %21 = vector.broadcast %cst_10 : f32 to vector<128x128xf32>
    %22 = arith.mulf %21, %19 : vector<128x128xf32>
    %23 = math.exp %22 : vector<128x128xf32>
    %24 = arith.addf %20, %23 : vector<128x128xf32>
    %cst_11 = arith.constant -5.000000e-01 : f32
    %25 = vector.broadcast %cst_11 : f32 to vector<128x128xf32>
    %26 = arith.mulf %25, %19 : vector<128x128xf32>
    %27 = math.exp %26 : vector<128x128xf32>
    %28 = arith.addf %24, %27 : vector<128x128xf32>
    %cst_12 = arith.constant -8.000000e-02 : f32
    %29 = vector.broadcast %cst_12 : f32 to vector<128x128xf32>
    %30 = arith.mulf %29, %19 : vector<128x128xf32>
    %31 = math.exp %30 : vector<128x128xf32>
    %32 = arith.addf %28, %31 : vector<128x128xf32>
    %cst_13 = arith.constant -2.000000e-02 : f32
    %33 = vector.broadcast %cst_13 : f32 to vector<128x128xf32>
    %34 = arith.mulf %33, %19 : vector<128x128xf32>
    %35 = math.exp %34 : vector<128x128xf32>
    %36 = arith.addf %32, %35 : vector<128x128xf32>
    %cst_14 = arith.constant 2.500000e-01 : f32
    %37 = vector.broadcast %cst_14 : f32 to vector<128x128xf32>
    %38 = arith.mulf %36, %37 : vector<128x128xf32>
    %c128_i32 = arith.constant 128 : i32
    %39 = arith.muli %arg0, %c128_i32 : i32
    %40 = tpu.iota {dimensions = array<i32: 0>} : vector<128x1xi32>
    %41 = vector.broadcast %39 : i32 to vector<128x1xi32>
    %42 = arith.addi %41, %40 : vector<128x1xi32>
    %c128_i32_15 = arith.constant 128 : i32
    %43 = arith.muli %arg1, %c128_i32_15 : i32
    %44 = tpu.iota {dimensions = array<i32: 1>} : vector<1x128xi32>
    %45 = vector.broadcast %43 : i32 to vector<1x128xi32>
    %46 = arith.addi %45, %44 : vector<1x128xi32>
    %c96_i32 = arith.constant 96 : i32
    %47 = vector.broadcast %c96_i32 : i32 to vector<128x1xi32>
    %48 = arith.cmpi slt, %42, %47 : vector<128x1xi32>
    %c192_i32 = arith.constant 192 : i32
    %49 = vector.broadcast %c192_i32 : i32 to vector<128x1xi32>
    %50 = arith.cmpi slt, %42, %49 : vector<128x1xi32>
    %cst_16 = arith.constant -0.010416667 : f32
    %cst_17 = arith.constant 0.000000e+00 : f32
    %51 = vector.broadcast %cst_16 : f32 to vector<128x1xf32>
    %52 = vector.broadcast %cst_17 : f32 to vector<128x1xf32>
    %53 = arith.select %50, %51, %52 : vector<128x1xi1>, vector<128x1xf32>
    %cst_18 = arith.constant 0.010416667 : f32
    %54 = vector.broadcast %cst_18 : f32 to vector<128x1xf32>
    %55 = arith.select %48, %54, %53 : vector<128x1xi1>, vector<128x1xf32>
    %c96_i32_19 = arith.constant 96 : i32
    %56 = vector.broadcast %c96_i32_19 : i32 to vector<1x128xi32>
    %57 = arith.cmpi slt, %46, %56 : vector<1x128xi32>
    %c192_i32_20 = arith.constant 192 : i32
    %58 = vector.broadcast %c192_i32_20 : i32 to vector<1x128xi32>
    %59 = arith.cmpi slt, %46, %58 : vector<1x128xi32>
    %cst_21 = arith.constant -0.010416667 : f32
    %cst_22 = arith.constant 0.000000e+00 : f32
    %60 = vector.broadcast %cst_21 : f32 to vector<1x128xf32>
    %61 = vector.broadcast %cst_22 : f32 to vector<1x128xf32>
    %62 = arith.select %59, %60, %61 : vector<1x128xi1>, vector<1x128xf32>
    %cst_23 = arith.constant 0.010416667 : f32
    %63 = vector.broadcast %cst_23 : f32 to vector<1x128xf32>
    %64 = arith.select %57, %63, %62 : vector<1x128xi1>, vector<1x128xf32>
    %65 = vector.broadcast %55 : vector<128x1xf32> to vector<128x128xf32>
    %66 = arith.mulf %65, %38 : vector<128x128xf32>
    %67 = vector.broadcast %64 : vector<1x128xf32> to vector<128x128xf32>
    %68 = arith.mulf %66, %67 : vector<128x128xf32>
    %69 = vector.extract_strided_slice %68 {offsets = [0, 0], sizes = [8, 128], strides = [1, 1]} : vector<128x128xf32> to vector<8x128xf32>
    %70 = vector.extract_strided_slice %68 {offsets = [8, 0], sizes = [8, 128], strides = [1, 1]} : vector<128x128xf32> to vector<8x128xf32>
    %71 = arith.addf %69, %70 : vector<8x128xf32>
    %72 = vector.extract_strided_slice %68 {offsets = [16, 0], sizes = [8, 128], strides = [1, 1]} : vector<128x128xf32> to vector<8x128xf32>
    %73 = arith.addf %71, %72 : vector<8x128xf32>
    %74 = vector.extract_strided_slice %68 {offsets = [24, 0], sizes = [8, 128], strides = [1, 1]} : vector<128x128xf32> to vector<8x128xf32>
    %75 = arith.addf %73, %74 : vector<8x128xf32>
    %76 = vector.extract_strided_slice %68 {offsets = [32, 0], sizes = [8, 128], strides = [1, 1]} : vector<128x128xf32> to vector<8x128xf32>
    %77 = arith.addf %75, %76 : vector<8x128xf32>
    %78 = vector.extract_strided_slice %68 {offsets = [40, 0], sizes = [8, 128], strides = [1, 1]} : vector<128x128xf32> to vector<8x128xf32>
    %79 = arith.addf %77, %78 : vector<8x128xf32>
    %80 = vector.extract_strided_slice %68 {offsets = [48, 0], sizes = [8, 128], strides = [1, 1]} : vector<128x128xf32> to vector<8x128xf32>
    %81 = arith.addf %79, %80 : vector<8x128xf32>
    %82 = vector.extract_strided_slice %68 {offsets = [56, 0], sizes = [8, 128], strides = [1, 1]} : vector<128x128xf32> to vector<8x128xf32>
    %83 = arith.addf %81, %82 : vector<8x128xf32>
    %84 = vector.extract_strided_slice %68 {offsets = [64, 0], sizes = [8, 128], strides = [1, 1]} : vector<128x128xf32> to vector<8x128xf32>
    %85 = arith.addf %83, %84 : vector<8x128xf32>
    %86 = vector.extract_strided_slice %68 {offsets = [72, 0], sizes = [8, 128], strides = [1, 1]} : vector<128x128xf32> to vector<8x128xf32>
    %87 = arith.addf %85, %86 : vector<8x128xf32>
    %88 = vector.extract_strided_slice %68 {offsets = [80, 0], sizes = [8, 128], strides = [1, 1]} : vector<128x128xf32> to vector<8x128xf32>
    %89 = arith.addf %87, %88 : vector<8x128xf32>
    %90 = vector.extract_strided_slice %68 {offsets = [88, 0], sizes = [8, 128], strides = [1, 1]} : vector<128x128xf32> to vector<8x128xf32>
    %91 = arith.addf %89, %90 : vector<8x128xf32>
    %92 = vector.extract_strided_slice %68 {offsets = [96, 0], sizes = [8, 128], strides = [1, 1]} : vector<128x128xf32> to vector<8x128xf32>
    %93 = arith.addf %91, %92 : vector<8x128xf32>
    %94 = vector.extract_strided_slice %68 {offsets = [104, 0], sizes = [8, 128], strides = [1, 1]} : vector<128x128xf32> to vector<8x128xf32>
    %95 = arith.addf %93, %94 : vector<8x128xf32>
    %96 = vector.extract_strided_slice %68 {offsets = [112, 0], sizes = [8, 128], strides = [1, 1]} : vector<128x128xf32> to vector<8x128xf32>
    %97 = arith.addf %95, %96 : vector<8x128xf32>
    %98 = vector.extract_strided_slice %68 {offsets = [120, 0], sizes = [8, 128], strides = [1, 1]} : vector<128x128xf32> to vector<8x128xf32>
    %99 = arith.addf %97, %98 : vector<8x128xf32>
    %c0_24 = arith.constant 0 : index
    %c0_25 = arith.constant 0 : index
    %100 = vector.load %arg5[%c0_24, %c0_25] : memref<8x128xf32, #tpu.memory_space<vmem>>, vector<8x128xf32>
    %101 = arith.addf %100, %99 : vector<8x128xf32>
    %c0_26 = arith.constant 0 : index
    %c0_27 = arith.constant 0 : index
    %102 = vector.load %arg5[%c0_26, %c0_27] : memref<8x128xf32, #tpu.memory_space<vmem>>, vector<8x128xf32>
    tpu.vector_store %arg5[%c0_26, %c0_27], %101 {strides = array<i32>} : memref<8x128xf32, #tpu.memory_space<vmem>>, vector<8x128xf32>,
    %c1_i32 = arith.constant 1 : i32
    %103 = arith.cmpi eq, %arg1, %c1_i32 : i32
    %104 = arith.extui %103 : i1 to i32
    %c0_i32_28 = arith.constant 0 : i32
    %105 = arith.cmpi ne, %104, %c0_i32_28 : i32
    scf.if %105 {
      %c0_29 = arith.constant 0 : index
      %c0_30 = arith.constant 0 : index
      %106 = vector.load %arg5[%c0_29, %c0_30] : memref<8x128xf32, #tpu.memory_space<vmem>>, vector<8x128xf32>
      %c0_31 = arith.constant 0 : index
      %c0_32 = arith.constant 0 : index
      %107 = vector.load %arg4[%c0_31, %c0_32] : memref<8x128xf32, #tpu.memory_space<vmem>>, vector<8x128xf32>
      tpu.vector_store %arg4[%c0_31, %c0_32], %106 {strides = array<i32>} : memref<8x128xf32, #tpu.memory_space<vmem>>, vector<8x128xf32>,
    } else {
    }
    return
  }
  func.func @transform_0(%arg0: i32, %arg1: i32) -> (i32, i32) {
    %c0_i32 = arith.constant 0 : i32
    %c0_i32_0 = arith.constant 0 : i32
    return %arg0, %c0_i32 : i32, i32
  }
  func.func @transform_1(%arg0: i32, %arg1: i32) -> (i32, i32) {
    %c0_i32 = arith.constant 0 : i32
    %c0_i32_0 = arith.constant 0 : i32
    return %arg1, %c0_i32 : i32, i32
  }
  func.func @transform_2(%arg0: i32, %arg1: i32) -> (i32, i32) {
    %c0_i32 = arith.constant 0 : i32
    %c0_i32_0 = arith.constant 0 : i32
    return %arg0, %c0_i32 : i32, i32
  }
}

</mosaic_0001>

<bundles_post_ra>
// kernel: tpu_custom_call.1
= control target key start
LH: loop header
LB: loop body
LE: loop exit
PB: predicated region body
PF: predicated region fallthrough
CT: control target
= control target key end

     0   :  { %7 = vsyncpa [#allocation4], 0  ;;  %s2338_s0 = inlined_call_operand.vmem [shape: f32[256,16], index: 0, kind: input, shape index: {}]   ;;  %s2339_s1 = inlined_call_operand.vmem [shape: f32[256,16], index: 1, kind: input, shape index: {}]   ;;  %s2340_s2 = inlined_call_operand.hbm [shape: f32[16,128], index: 2, kind: output, shape index: {}]  }
   0x1   :  { %9 = vsyncpa [#allocation4 + $0x1], 0  ;;  %s1782_s9 = smov 0   ;;  %s1784_s10 = smov 0  }
   0x2   :  { %s1786_s11 = smov 0   ;;  %s1788_s12 = smov 0  }
   0x3   :  { %s1790_s13 = smov 0   ;;  %s1792_s14 = smov 0  }
   0x4   :  { %s1794_s15 = smov 0   ;;  %s1796_s16 = smov 0  }
   0x5 LB: > { %s1258_s17 = sadd.s32 4294967295, %s1760_s16   ;;  %s1259_s18 = sadd.s32 4294967294, %s1760_s16   ;;  %s1760_s16 = sphi %s1796_s16, %s15_s16   ;;  %s1756_s15 = sphi %s1794_s15, %s2349_s15   ;;  %s1752_s14 = sphi %s1792_s14, %s2348_s14   ;;  %s1748_s13 = sphi %s1790_s13, %s2347_s13   ;;  %s1744_s12 = sphi %s1788_s12, %s2346_s12   ;;  %s1740_s11 = sphi %s1786_s11, %s2345_s11   ;;  %s1736_s10 = sphi %s1784_s10, %s2344_s10   ;;  %s1732_s9 = sphi %s1782_s9, %s2343_s9  }
   0x6   : > { %s24_s19 = sadd.s32 1, %s1752_s14  ;;  %s27_s20 = sadd.s32 1, %s1756_s15 }
   0x7   : > { %p25_p0 = scmp.ge.s32.totalorder %s24_s19, 2  ;;  %p96_p1 = scmp.ne.s32.totalorder %s1740_s11, %s1736_s10 }
   0x8   : > { %p97_p2 = scmp.eq.s32.totalorder %s1258_s17, 3  ;;  %p102_p4 = scmp.ne.s32.totalorder %s1736_s10, %s1732_s9 }
   0x9   : > { %s2351_s19 = smov (%p25_p0, %s24_s19), 0  ;;  %s2353_s20 = smov (!%p25_p0, %s27_s20), %s1756_s15 }
   0xa   : > { %p1831_p3 = por %p97_p2, %p96_p1  ;;  %p29_p5 = scmp.ge.s32.totalorder %s2353_s20, 2 }
   0xb   : > { %p103_p6 = scmp.eq.s32.totalorder %s1259_s18, 3  ;;  %p1262_p7 = scmp.ge.s32.totalorder %s1760_s16, 1 }
   0xc   : > { %p139_p8 = scmp.lt.s32.totalorder %s1760_s16, 5  ;;  %s2355_s20 = smov (%p29_p5, %s2353_s20), 0 }
   0xd   : > { %p1841_p9 = por %p103_p6, %p102_p4  ;;  %s83_s23 = ssub.s32 %s1756_s15, %s2355_s20 }
   0xe   : > { %p140_p10 = pnand %p1262_p7, %p139_p8  ;;  %s86_s24 = sadd.s32 1, %s1740_s11 }
   0xf   : > { %p84_p11 = scmp.eq.s32.totalorder %s83_s23, 0  ;;  %s163_s26 = sand.u32 (!%p140_p10), 1, %s1736_s10  }
  0x10   : > { %143 = sbr.rel (%p140_p10) target bundleno = 438 (0x1b6), region = 28  ;;  %s1264_s27 = sshll.u32 (!%p140_p10), %s1748_s13, 4 }
  0x11   : > { %s1849_s25 = scalar_select %p84_p11, %s1740_s11, %s86_s24  }
  0x12   : > { %s1855_s28 = sshll.u32 (!%p140_p10), %s163_s26, 3  ;;  %p167_p12 = scmp.lt.s32.totalorder (!%p140_p10), %s1264_s27, 31 }
  0x13   : > { %s1266_s29 = sshll.u32 (!%p140_p10), %s1744_s12, 4  ;;  %s165_s18 = scalar_lea.vmem (!%p140_p10), [#allocation3], %s1855_s28 }
  0x14   : > { %p173_p13 = scmp.lt.s32.totalorder (!%p140_p10), %s1266_s29, 31  ;;  %p1268_p0 = scmp.ne.s32.totalorder (!%p140_p10), %s1744_s12, 0 }
  0x15   : > { %s2357_s27 = smov (!%p167_p12, %s1264_s27), 31 }
  0x16   : > { %s1265_s30 = sshll.u32 %s2357_s27, 3  ;;  %s2359_s29 = smov (!%p173_p13, %s1266_s29), 31 }
  0x17   : > { %s1861_s5 = scalar_lea.vmem %s2338_s0, %s1265_s30  ;;  %s1267_s6 = sshll.u32 %s2359_s29, 3 }
  0x18   : > { %s1866_s17 = scalar_lea.vmem %s2339_s1, %s1267_s6  ;;  %181 = sbr.rel (%p1268_p0) target bundleno = 31 (0x1f), region = 32 }
  0x1d   : > { %v1762_v0 = vmov 0.0  }
  0x1e   : > { %182 = vst [vmem:[#allocation2] sm:$0xff] %v1762_v0 }
  0x1f PF: > { %v214_v1 = vld [vmem:[%s1866_s17 + $0x78] sm:$0xff]  ;;  %vm231_vm0 = vcmask 130048   ;;  %v213_v2 = vld [vmem:[%s1866_s17 + $0x70] sm:$0xff]  ;;  %v1763_v3 = vmov 0.0   ;;  %vm1764_vm1 = vmmov 0   ;;  %v212_v6 = vld [vmem:[%s1866_s17 + $0x68] sm:$0xff] }
  0x20   : > { %1409 = vmatprep.subr.msk.mxu1 %vm231_vm0, %v214_v1  ;;  %1374 = vmatprep.subr.mxu0 %v1763_v3  ;;  %v295_v4 = vmul.f32 %v214_v1, %v214_v1  ;;  %v294_v5 = vmul.f32 %v213_v2, %v213_v2  ;;  %v183_v7 = vld [vmem:[%s1861_s5] sm:$0xff]  ;;  %v1882_v8 = vld [vmem:[%s1861_s5 + $0x8] sm:$0xff]  ;;  %v1887_v10 = vld [vmem:[%s1861_s5 + $0x10] sm:$0xff]  ;;  %v293_v13 = vmul.f32 %v212_v6, %v212_v6  ;;  %s1318_s23 = sshll.u32 %s1748_s13, 7  ;;  %s1319_s24 = sshll.u32 %s1744_s12, 7 }
  0x21   : > { %1410 = vmatpush3.xpose.msk.msra.mxu1 %vm231_vm0, %v214_v1  ;;  %1406 = vmatprep.mubr.msk.f32.mxu0 %vm1764_vm1, %v1763_v3  ;;  %v215_v9 = vmul.f32 %v183_v7, %v183_v7  ;;  %v1890_v11 = vld [vmem:[%s1861_s5 + $0x18] sm:$0xff]  ;;  %v216_v12 = vmul.f32 %v1882_v8, %v1882_v8  ;;  %v217_v14 = vmul.f32 %v1887_v10, %v1887_v10  ;;  %v211_v16 = vld [vmem:[%s1866_s17 + $0x60] sm:$0xff]  ;;  %v1909_v20 = vld [vmem:[%s1861_s5 + $0x28] sm:$0xff]  ;;  %p1320_p1 = scmp.ne.s32.totalorder %s1744_s12, 1 }
  0x22   : > { %1375 = vmatpush3.xpose.msk.msra.mxu0 %vm231_vm0, %v295_v4  ;;  %1411 = vmatprep.subr.msk.mxu1 %vm231_vm0, %v213_v2  ;;  %v218_v15 = vmul.f32 %v1890_v11, %v1890_v11  ;;  %v1904_v18 = vld [vmem:[%s1861_s5 + $0x20] sm:$0xff]  ;;  %v292_v23 = vmul.f32 %v211_v16, %v211_v16  ;;  %v220_v25 = vmul.f32 %v1909_v20, %v1909_v20  ;;  %v210_v26 = vld [vmem:[%s1866_s17 + $0x58] sm:$0xff]  ;;  %v1922_v27 = vld [vmem:[%s1861_s5 + $0x30] sm:$0xff] }
  0x23   : > { %1376 = vmatprep.subr.mxu0 %v1763_v3  ;;  %1441 = vmatprep.mubr.msk.f32.mxu1 %vm231_vm0, %v183_v7  ;;  %v232_v17 = vsel %vm231_vm0, %v215_v9, 0.0  ;;  %v238_v19 = vsel %vm231_vm0, %v217_v14, 0.0  ;;  %v235_v21 = vsel %vm231_vm0, %v216_v12, 0.0  ;;  %v219_v22 = vmul.f32 %v1904_v18, %v1904_v18  ;;  %v1926_v28 = vld [vmem:[%s1861_s5 + $0x38] sm:$0xff]  ;;  %v209_v34 = vld [vmem:[%s1866_s17 + $0x50] sm:$0xff]  ;;  %v1939_v35 = vld [vmem:[%s1861_s5 + $0x40] sm:$0xff] }
  0x24   : > { %233 = vadd.xlane.f32.xlu0 %v232_v17  ;;  %239 = vadd.xlane.f32.xlu1 %v238_v19  ;;  %v241_v24 = vsel %vm231_vm0, %v218_v15, 0.0  ;;  %v221_v30 = vmul.f32 %v1922_v27, %v1922_v27  ;;  %v291_v31 = vmul.f32 %v210_v26, %v210_v26  ;;  %v247_v32 = vsel %vm231_vm0, %v220_v25, 0.0  ;;  %v1943_v36 = vld [vmem:[%s1861_s5 + $0x48] sm:$0xff]  ;;  %v1956_v43 = vld [vmem:[%s1861_s5 + $0x50] sm:$0xff]  ;;  %v1960_v44 = vld [vmem:[%s1861_s5 + $0x58] sm:$0xff] }
  0x25   : > { %1412 = vmatpush3.xpose.msk.msra.mxu1 %vm231_vm0, %v213_v2  ;;  %v244_v29 = vsel %vm231_vm0, %v219_v22, 0.0  ;;  %v222_v33 = vmul.f32 %v1926_v28, %v1926_v28  ;;  %v223_v38 = vmul.f32 %v1939_v35, %v1939_v35  ;;  %v290_v39 = vmul.f32 %v209_v34, %v209_v34  ;;  %v208_v42 = vld [vmem:[%s1866_s17 + $0x48] sm:$0xff]  ;;  %v207_v50 = vld [vmem:[%s1866_s17 + $0x40] sm:$0xff]  ;;  %v206_v58 = vld [vmem:[%s1866_s17 + $0x38] sm:$0xff] }
  0x26   : > { %1377 = vmatpush3.xpose.msk.msra.mxu0 %vm231_vm0, %v294_v5  ;;  %1413 = vmatprep.subr.msk.mxu1 %vm231_vm0, %v212_v6  ;;  %v250_v37 = vsel %vm231_vm0, %v221_v30, 0.0  ;;  %v224_v41 = vmul.f32 %v1943_v36, %v1943_v36  ;;  %v225_v46 = vmul.f32 %v1956_v43, %v1956_v43  ;;  %v289_v47 = vmul.f32 %v208_v42, %v208_v42  ;;  %v1973_v51 = vld [vmem:[%s1861_s5 + $0x60] sm:$0xff]  ;;  %v1977_v52 = vld [vmem:[%s1861_s5 + $0x68] sm:$0xff]  ;;  %v1990_v59 = vld [vmem:[%s1861_s5 + $0x70] sm:$0xff] }
  0x27   : > { %1378 = vmatprep.subr.mxu0 %v1763_v3  ;;  %v253_v40 = vsel %vm231_vm0, %v222_v33, 0.0  ;;  %v256_v45 = vsel %vm231_vm0, %v223_v38, 0.0  ;;  %v226_v49 = vmul.f32 %v1960_v44, %v1960_v44  ;;  %v227_v54 = vmul.f32 %v1973_v51, %v1973_v51  ;;  %v1994_v60 = vld [vmem:[%s1861_s5 + $0x78] sm:$0xff]  ;;  %v205_v2 = vld [vmem:[%s1866_s17 + $0x30] sm:$0xff]  ;;  %v204_v7 = vld [vmem:[%s1866_s17 + $0x28] sm:$0xff] }
  0x28   : > { %236 = vadd.xlane.f32.xlu0 %v235_v21  ;;  %242 = vadd.xlane.f32.xlu1 %v241_v24  ;;  %v259_v48 = vsel %vm231_vm0, %v224_v41, 0.0  ;;  %v262_v53 = vsel %vm231_vm0, %v225_v46, 0.0  ;;  %v288_v55 = vmul.f32 %v207_v50, %v207_v50  ;;  %v228_v57 = vmul.f32 %v1977_v52, %v1977_v52  ;;  %v203_v12 = vld [vmem:[%s1866_s17 + $0x20] sm:$0xff]  ;;  %v202_v14 = vld [vmem:[%s1866_s17 + $0x18] sm:$0xff]  ;;  %v200_v19 = vld [vmem:[%s1866_s17 + $0x8] sm:$0xff] }
  0x29   : > { %1414 = vmatpush3.xpose.msk.msra.mxu1 %vm231_vm0, %v212_v6  ;;  %v265_v56 = vsel %vm231_vm0, %v226_v49, 0.0  ;;  %v268_v61 = vsel %vm231_vm0, %v227_v54, 0.0  ;;  %v229_v62 = vmul.f32 %v1990_v59, %v1990_v59  ;;  %v287_v63 = vmul.f32 %v206_v58, %v206_v58  ;;  %v199_v22 = vld [vmem:[%s1866_s17] sm:$0xff] }
  0x2a   : > { %1379 = vmatpush3.xpose.msk.msra.mxu0 %vm231_vm0, %v293_v13  ;;  %1415 = vmatprep.subr.msk.mxu1 %vm231_vm0, %v211_v16  ;;  %v271_v0 = vsel %vm231_vm0, %v228_v57, 0.0  ;;  %v230_v1 = vmul.f32 %v1994_v60, %v1994_v60  ;;  %v286_v5 = vmul.f32 %v205_v2, %v205_v2  ;;  %v285_v9 = vmul.f32 %v204_v7, %v204_v7 }
  0x2b   : > { %1380 = vmatprep.subr.mxu0 %v1763_v3  ;;  %v274_v4 = vsel %vm231_vm0, %v229_v62, 0.0  ;;  %v284_v13 = vmul.f32 %v203_v12, %v203_v12  ;;  %v283_v15 = vmul.f32 %v202_v14, %v202_v14  ;;  %v281_v21 = vmul.f32 %v200_v19, %v200_v19 }
  0x2c   : > { %245 = vadd.xlane.f32.xlu0 %v244_v29  ;;  %248 = vadd.xlane.f32.xlu1 %v247_v32  ;;  %v277_v6 = vsel %vm231_vm0, %v230_v1, 0.0  ;;  %v1765_v24 = vmov 1.0  }
  0x2d   : > { %1416 = vmatpush3.xpose.msk.msra.mxu1 %vm231_vm0, %v211_v16  ;;  %v201_v16 = vld [vmem:[%s1866_s17 + $0x10] sm:$0xff] }
  0x2e   : > { %1381 = vmatpush3.xpose.msk.msra.mxu0 %vm231_vm0, %v292_v23  ;;  %1417 = vmatprep.subr.msk.mxu1 %vm231_vm0, %v210_v26  ;;  %v282_v17 = vmul.f32 %v201_v16, %v201_v16  ;;  %v280_v23 = vmul.f32 %v199_v22, %v199_v22 }
  0x2f   : > { %1382 = vmatprep.subr.mxu0 %v1763_v3 }
  0x30   : > { %251 = vadd.xlane.f32.xlu0 %v250_v37  ;;  %254 = vadd.xlane.f32.xlu1 %v253_v40 }
  0x31   : > { %1418 = vmatpush3.xpose.msk.msra.mxu1 %vm231_vm0, %v210_v26 }
  0x32   : > { %1383 = vmatpush3.xpose.msk.msra.mxu0 %vm231_vm0, %v291_v31  ;;  %1419 = vmatprep.subr.msk.mxu1 %vm231_vm0, %v209_v34 }
  0x33   : > { %1384 = vmatprep.subr.mxu0 %v1763_v3 }
  0x34   : > { %257 = vadd.xlane.f32.xlu0 %v256_v45  ;;  %260 = vadd.xlane.f32.xlu1 %v259_v48 }
  0x35   : > { %1420 = vmatpush3.xpose.msk.msra.mxu1 %vm231_vm0, %v209_v34 }
  0x36   : > { %1385 = vmatpush3.xpose.msk.msra.mxu0 %vm231_vm0, %v290_v39  ;;  %1421 = vmatprep.subr.msk.mxu1 %vm231_vm0, %v208_v42 }
  0x37   : > { %1386 = vmatprep.subr.mxu0 %v1763_v3 }
  0x38   : > { %263 = vadd.xlane.f32.xlu0 %v262_v53  ;;  %266 = vadd.xlane.f32.xlu1 %v265_v56 }
  0x39   : > { %1422 = vmatpush3.xpose.msk.msra.mxu1 %vm231_vm0, %v208_v42 }
  0x3a   : > { %1387 = vmatpush3.xpose.msk.msra.mxu0 %vm231_vm0, %v289_v47  ;;  %1423 = vmatprep.subr.msk.mxu1 %vm231_vm0, %v207_v50 }
  0x3b   : > { %1388 = vmatprep.subr.mxu0 %v1763_v3 }
  0x3c   : > { %269 = vadd.xlane.f32.xlu0 %v268_v61  ;;  %272 = vadd.xlane.f32.xlu1 %v271_v0 }
  0x3d   : > { %1424 = vmatpush3.xpose.msk.msra.mxu1 %vm231_vm0, %v207_v50 }
  0x3e   : > { %1389 = vmatpush3.xpose.msk.msra.mxu0 %vm231_vm0, %v288_v55  ;;  %1425 = vmatprep.subr.msk.mxu1 %vm231_vm0, %v206_v58 }
  0x3f   : > { %1390 = vmatprep.subr.mxu0 %v1763_v3 }
  0x40   : > { %275 = vadd.xlane.f32.xlu0 %v274_v4  ;;  %278 = vadd.xlane.f32.xlu1 %v277_v6 }
  0x41   : > { %1426 = vmatpush3.xpose.msk.msra.mxu1 %vm231_vm0, %v206_v58 }
  0x42   : > { %1391 = vmatpush3.xpose.msk.msra.mxu0 %vm231_vm0, %v287_v63  ;;  %1427 = vmatprep.subr.msk.mxu1 %vm231_vm0, %v205_v2 }
  0x43   : > { %1392 = vmatprep.subr.mxu0 %v1763_v3 }
  0x45   : > { %1428 = vmatpush3.xpose.msk.msra.mxu1 %vm231_vm0, %v205_v2 }
  0x46   : > { %1393 = vmatpush3.xpose.msk.msra.mxu0 %vm231_vm0, %v286_v5  ;;  %1429 = vmatprep.subr.msk.mxu1 %vm231_vm0, %v204_v7 }
  0x47   : > { %1394 = vmatprep.subr.mxu0 %v1763_v3 }
  0x49   : > { %1430 = vmatpush3.xpose.msk.msra.mxu1 %vm231_vm0, %v204_v7 }
  0x4a   : > { %1395 = vmatpush3.xpose.msk.msra.mxu0 %vm231_vm0, %v285_v9  ;;  %1431 = vmatprep.subr.msk.mxu1 %vm231_vm0, %v203_v12 }
  0x4b   : > { %1396 = vmatprep.subr.mxu0 %v1763_v3 }
  0x4d   : > { %1432 = vmatpush3.xpose.msk.msra.mxu1 %vm231_vm0, %v203_v12 }
  0x4e   : > { %1397 = vmatpush3.xpose.msk.msra.mxu0 %vm231_vm0, %v284_v13  ;;  %1433 = vmatprep.subr.msk.mxu1 %vm231_vm0, %v202_v14 }
  0x4f   : > { %1398 = vmatprep.subr.mxu0 %v1763_v3 }
  0x51   : > { %1434 = vmatpush3.xpose.msk.msra.mxu1 %vm231_vm0, %v202_v14 }
  0x52   : > { %1399 = vmatpush3.xpose.msk.msra.mxu0 %vm231_vm0, %v283_v15  ;;  %1435 = vmatprep.subr.msk.mxu1 %vm231_vm0, %v201_v16 }
  0x53   : > { %1400 = vmatprep.subr.mxu0 %v1763_v3 }
  0x55   : > { %1436 = vmatpush3.xpose.msk.msra.mxu1 %vm231_vm0, %v201_v16 }
  0x56   : > { %1401 = vmatpush3.xpose.msk.msra.mxu0 %vm231_vm0, %v282_v17  ;;  %1437 = vmatprep.subr.msk.mxu1 %vm231_vm0, %v200_v19 }
  0x57   : > { %1402 = vmatprep.subr.mxu0 %v1763_v3 }
  0x59   : > { %1438 = vmatpush3.xpose.msk.msra.mxu1 %vm231_vm0, %v200_v19 }
  0x5a   : > { %1403 = vmatpush3.xpose.msk.msra.mxu0 %vm231_vm0, %v281_v21  ;;  %1439 = vmatprep.subr.msk.mxu1 %vm231_vm0, %v199_v22 }
  0x5b   : > { %1404 = vmatprep.subr.mxu0 %v1763_v3 }
  0x5d   : > { %1440 = vmatpush3.xpose.msk.msra.mxu1 %vm231_vm0, %v199_v22 }
  0x5e   : > { %1405 = vmatpush3.xpose.msk.msra.mxu0 %vm231_vm0, %v280_v23 }
  0x60   : > { %1442 = vmatmul.mubr.msk.f32.vlgmr.msra.gmra.mxu1 %vm231_vm0, %v1882_v8 }
  0x61   : > { %1407 = vmatmul.mubr.msk.f32.vlgmr.msra.gmra.mxu0 %vm231_vm0, %v1765_v24  ;;  %1444 = vmatprep.mubr.msk.f32.mxu1 %vm231_vm0, %v1887_v10 }
  0x64   : > { %1445 = vmatmul.mubr.msk.f32.gmra.mxu1 %vm231_vm0, %v1890_v11 }
  0x65   : > { %1447 = vmatprep.mubr.msk.f32.mxu1 %vm231_vm0, %v1904_v18 }
  0x68   : > { %1448 = vmatmul.mubr.msk.f32.gmra.mxu1 %vm231_vm0, %v1909_v20  ;;  %v658_v20 = vlaneseq }
  0x69   : > { %1450 = vmatprep.mubr.msk.f32.mxu1 %vm231_vm0, %v1922_v27 }
  0x6a   : > { %v2086_v26 = vshrl.u32 %v658_v20, 7  ;;  %v1035_v33 = vand.u32 127, %v658_v20 }
  0x6c   : > { %1451 = vmatmul.mubr.msk.f32.gmra.mxu1 %vm231_vm0, %v1926_v28  ;;  %v2092_v28 = vstv %s1318_s23  ;;  %v1001_v29 = vadd.s32 8, %v2086_v26  ;;  %v1003_v34 = vadd.s32 24, %v2086_v26  ;;  %v1002_v37 = vadd.s32 16, %v2086_v26 }
  0x6d   : > { %1453 = vmatprep.mubr.msk.f32.mxu1 %vm231_vm0, %v1939_v35  ;;  %v1017_v30 = vadd.s32 %v2092_v28, %v2086_v26  ;;  %v1005_v38 = vadd.s32 40, %v2086_v26  ;;  %v1004_v39 = vadd.s32 32, %v2086_v26  ;;  %v1007_v46 = vadd.s32 56, %v2086_v26 }
  0x6e   : > { %v1018_v32 = vadd.s32 %v2092_v28, %v1001_v29  ;;  %v1020_v41 = vadd.s32 %v2092_v28, %v1003_v34  ;;  %v1006_v48 = vadd.s32 48, %v2086_v26  ;;  %v660_v50 = vsub.s32 0, %v2086_v26 }
  0x6f   : > { %vm1054_vm2 = vcmp.lt.s32.totalorder %v1017_v30, 192  ;;  %vm1038_vm3 = vcmp.lt.s32.totalorder %v1017_v30, 96  ;;  %v1022_v45 = vadd.s32 %v2092_v28, %v1005_v38  ;;  %v1021_v47 = vadd.s32 %v2092_v28, %v1004_v39 }
  0x70   : > { %1454 = vmatmul.mubr.msk.f32.gmra.mxu1 %vm231_vm0, %v1943_v36  ;;  %v1036_v36 = vstv %s1319_s24  ;;  %vm1055_vm4 = vcmp.lt.s32.totalorder %v1018_v32, 192  ;;  %vm1039_vm5 = vcmp.lt.s32.totalorder %v1018_v32, 96  ;;  %vm1057_vm8 = vcmp.lt.s32.totalorder %v1020_v41, 192 }
  0x71   : > { %1456 = vmatprep.mubr.msk.f32.mxu1 %vm231_vm0, %v1956_v43  ;;  %v1037_v40 = vadd.s32 %v1036_v36, %v1035_v33  ;;  %v1070_v43 = vsel %vm1054_vm2, -0.010416667, %v1763_v3  ;;  %vm1059_vm10 = vcmp.lt.s32.totalorder %v1022_v45, 192  ;;  %v1024_v54 = vadd.s32 %v2092_v28, %v1007_v46 }
  0x72   : > { %v2121_v53 = vsel %vm1038_vm3, 0.010416667, %v1070_v43  ;;  %v1008_v55 = vadd.s32 64, %v2086_v26  ;;  %vm1058_vm11 = vcmp.lt.s32.totalorder %v1021_v47, 192  ;;  %v1023_v57 = vadd.s32 %v2092_v28, %v1006_v48 }
  0x73   : > { %vm1102_vm6 = vcmp.lt.s32.totalorder %v1037_v40, 96  ;;  %vm1103_vm7 = vcmp.lt.s32.totalorder %v1037_v40, 192  ;;  %v1010_v58 = vadd.s32 80, %v2086_v26  ;;  %vm1041_vm12 = vcmp.lt.s32.totalorder %v1020_v41, 96 }
  0x74   : > { %1457 = vmatmul.mubr.msk.f32.gmra.mxu1 %vm231_vm0, %v1960_v44  ;;  %v1019_v44 = vadd.s32 %v2092_v28, %v1002_v37  ;;  %v1073_v61 = vsel %vm1057_vm8, -0.010416667, %v1763_v3  ;;  %vm1043_vm14 = vcmp.lt.s32.totalorder %v1022_v45, 96  ;;  %v1075_v0 = vsel %vm1059_vm10, -0.010416667, %v1763_v3 }
  0x75   : > { %1459 = vmatprep.mubr.msk.f32.mxu1 %vm231_vm0, %v1973_v51  ;;  %v1071_v51 = vsel %vm1055_vm4, -0.010416667, %v1763_v3  ;;  %vm1042_vm15 = vcmp.lt.s32.totalorder %v1021_v47, 96  ;;  %v1074_v2 = vsel %vm1058_vm11, -0.010416667, %v1763_v3  ;;  %v1025_v4 = vadd.s32 %v2092_v28, %v1008_v55 }
  0x76   : > { %vm1056_vm9 = vcmp.lt.s32.totalorder %v1019_v44, 192  ;;  %v2125_v56 = vsel %vm1039_vm5, 0.010416667, %v1071_v51  ;;  %vm1040_vm13 = vcmp.lt.s32.totalorder %v1019_v44, 96  ;;  %v2143_v6 = vsel %vm1041_vm12, 0.010416667, %v1073_v61 }
  0x77   : > { %v1072_v63 = vsel %vm1056_vm9, -0.010416667, %v1763_v3  ;;  %vm1060_vm1 = vcmp.lt.s32.totalorder %v1023_v57, 192  ;;  %v1027_v7 = vadd.s32 %v2092_v28, %v1010_v58  ;;  %v2148_v13 = vsel %vm1043_vm14, 0.010416667, %v1075_v0 }
  0x78   : > { %1460 = vmatmul.mubr.msk.f32.gmra.mxu1 %vm231_vm0, %v1977_v52  ;;  %v1009_v52 = vadd.s32 72, %v2086_v26  ;;  %v2146_v12 = vsel %vm1040_vm13, 0.010416667, %v1072_v63  ;;  %v2150_v15 = vsel %vm1042_vm15, 0.010416667, %v1074_v2  ;;  %vm1045_vm3 = vcmp.lt.s32.totalorder %v1024_v54, 96 }
  0x79   : > { %1462 = vmatprep.mubr.msk.f32.mxu1 %vm231_vm0, %v1990_v59  ;;  %vm1044_vm4 = vcmp.lt.s32.totalorder %v1023_v57, 96  ;;  %v1076_v22 = vsel %vm1060_vm1, -0.010416667, %v1763_v3  ;;  %vm1062_vm5 = vcmp.lt.s32.totalorder %v1025_v4, 192  ;;  %vm1046_vm8 = vcmp.lt.s32.totalorder %v1025_v4, 96 }
  0x7a   : > { %v1026_v62 = vadd.s32 %v2092_v28, %v1009_v52  ;;  %v1078_v38 = vsel %vm1062_vm5, -0.010416667, %v1763_v3  ;;  %v1011_v39 = vadd.s32 88, %v2086_v26  ;;  %vm1048_vm9 = vcmp.lt.s32.totalorder %v1027_v7, 96 }
  0x7b   : > { %v2180_v52 = vsel %vm1046_vm8, 0.010416667, %v1078_v38 }
  0x7c   : > { %1463 = vmatmul.mubr.msk.f32.gmra.mxu1 %vm231_vm0, %v1994_v60  ;;  %v1104_v60 = vsel %vm1103_vm7, -0.010416667, %v1763_v3  ;;  %vm1061_vm0 = vcmp.lt.s32.totalorder %v1024_v54, 192  ;;  %vm1063_vm2 = vcmp.lt.s32.totalorder %v1026_v62, 192  ;;  %vm1064_vm7 = vcmp.lt.s32.totalorder %v1027_v7, 192 }
  0x7d   : > { %v2141_v5 = vsel %vm1102_vm6, 0.010416667, %v1104_v60  ;;  %v1077_v16 = vsel %vm1061_vm0, -0.010416667, %v1763_v3  ;;  %vm1047_vm6 = vcmp.lt.s32.totalorder %v1026_v62, 96  ;;  %v2185_v58 = vadd.s32 %v2092_v28, %v1011_v39 }
  0x7e   : > { %v1079_v20 = vsel %vm1063_vm2, -0.010416667, %v1763_v3  ;;  %v1080_v44 = vsel %vm1064_vm7, -0.010416667, %v1763_v3  ;;  %v2171_v45 = vsel %vm1045_vm3, 0.010416667, %v1077_v16 }
  0x7f   : > { %v2187_v57 = vsel %vm1048_vm9, 0.010416667, %v1080_v44  ;;  %vm1065_vm10 = vcmp.lt.s32.totalorder %v2185_v58, 192  ;;  %vm1049_vm11 = vcmp.lt.s32.totalorder %v2185_v58, 96 }
  0xad   : > { %v2075_v8 = vpop.xlane.xlu1 %239  ;;  %v2077_v10 = vpop.xlane.xlu0 %233 }
  0xb1   : > { %v2079_v11 = vpop.xlane.xlu1 %242  ;;  %v2081_v18 = vpop.xlane.xlu0 %236 }
  0xb5   : > { %v2084_v25 = vpop.xlane.xlu1 %248  ;;  %v2088_v27 = vpop.xlane.xlu0 %245 }
  0xb9   : > { %v2098_v31 = vpop.xlane.xlu1 %254  ;;  %v2102_v35 = vpop.xlane.xlu0 %251 }
  0xbd   : > { %v2108_v42 = vpop.xlane.xlu1 %260  ;;  %v2116_v49 = vpop.xlane.xlu0 %257 }
  0xc1   : > { %v2129_v59 = vpop.xlane.xlu1 %266  ;;  %v2136_v1 = vpop.xlane.xlu0 %263 }
  0xc5   : > { %v2153_v17 = vpop.xlane.xlu1 %272  ;;  %v2159_v30 = vpop.xlane.xlu0 %269 }
  0xc9   : > { %v279_v48 = vpop.xlane.xlu1 %278  ;;  %v276_v0 = vpop.xlane.xlu0 %275 }
 0x120   : > { %v1443_v9 = vpop.f32.mrf.mxu1 }
 0x121   : > { %v413_v14 = vpop.f32.mrf.mxu0  ;;  %v679_v29 = vmul.f32 2.0, %v1443_v9 }
 0x122   : > { %v2155_v19 = vrot.slane %v413_v14, %v660_v50  ;;  %v579_v21 = vpop.f32.mrf.mxu1 }
 0x123   : > { %v678_v23 = vmul.f32 2.0, %v579_v21  ;;  %v1408_v24 = vpop.f32.mrf.mxu0 }
 0x124   : > { %v662_v32 = vadd.f32 %v2155_v19, %v2077_v10  ;;  %v663_v33 = vadd.f32 %v2155_v19, %v2081_v18  ;;  %v1446_v34 = vpop.f32.mrf.mxu1  ;;  %v665_v36 = vadd.f32 %v2155_v19, %v2079_v11  ;;  %v2174_v18 = vsel %vm1044_vm4, 0.010416667, %v1076_v22 }
 0x125   : > { %v681_v37 = vmul.f32 2.0, %v1446_v34  ;;  %v2177_v11 = vsel %vm1047_vm6, 0.010416667, %v1079_v20  ;;  %v664_v54 = vadd.f32 %v2155_v19, %v2075_v8  ;;  %v2190_v4 = vadd.f32 %v2155_v19, %v279_v48 }
 0x126   : > { %v694_v40 = vsub.f32 %v662_v32, %v678_v23  ;;  %v695_v41 = vsub.f32 %v663_v33, %v679_v29  ;;  %v589_v43 = vpop.f32.mrf.mxu1  ;;  %v2193_v24 = vadd.f32 %v2155_v19, %v276_v0  ;;  %v667_v20 = vadd.f32 %v2155_v19, %v2084_v25 }
 0x127   : > { %v697_v10 = vsub.f32 %v665_v36, %v681_v37  ;;  %v680_v50 = vmul.f32 2.0, %v589_v43  ;;  %v666_v34 = vadd.f32 %v2155_v19, %v2088_v27  ;;  %v669_v38 = vadd.f32 %v2155_v19, %v2098_v31 }
 0x128   : > { %v710_v46 = vmax.f32 %v694_v40, 0.0  ;;  %v711_v47 = vmax.f32 %v695_v41, 0.0  ;;  %v1449_v51 = vpop.f32.mrf.mxu1  ;;  %v2203_v44 = vadd.f32 %v2155_v19, %v2102_v35  ;;  %v2207_v48 = vadd.f32 %v2155_v19, %v2108_v42 }
 0x129   : > { %v713_v55 = vmax.f32 %v697_v10, 0.0  ;;  %v683_v9 = vmul.f32 2.0, %v1449_v51  ;;  %v696_v8 = vsub.f32 %v664_v54, %v680_v50 }
 0x12a   : > { %v726_v60 = vmul.f32 -2.0, %v710_v46  ;;  %v727_v61 = vmul.f32 -2.0, %v711_v47  ;;  %v790_v62 = vmul.f32 -0.5, %v710_v46  ;;  %v791_v63 = vmul.f32 -0.5, %v711_v47  ;;  %v599_v33 = vpop.f32.mrf.mxu1 }
 0x12b   : > { %v854_v2 = vmul.f32 -0.08, %v710_v46  ;;  %v855_v7 = vmul.f32 -0.08, %v711_v47  ;;  %v918_v23 = vmul.f32 -0.02, %v710_v46  ;;  %v699_v37 = vsub.f32 %v667_v20, %v683_v9 }
 0x12c   : > { %v742_v14 = vmul.f32 1.442695, %v726_v60  ;;  %v744_v16 = vmul.f32 1.442695, %v727_v61  ;;  %v806_v21 = vmul.f32 1.442695, %v790_v62  ;;  %v1452_v46 = vpop.f32.mrf.mxu1  ;;  %v2211_v61 = vadd.f32 %v2155_v19, %v2116_v49 }
 0x12d   : > { %v808_v22 = vmul.f32 1.442695, %v791_v63  ;;  %v870_v29 = vmul.f32 1.442695, %v854_v2  ;;  %v729_v32 = vmul.f32 -2.0, %v713_v55  ;;  %v793_v36 = vmul.f32 -0.5, %v713_v55 }
 0x12e   : > { %1540 = vpow2.f32 %v742_v14  ;;  %v872_v39 = vmul.f32 1.442695, %v855_v7  ;;  %v919_v40 = vmul.f32 -0.02, %v711_v47  ;;  %v712_v41 = vmax.f32 %v696_v8, 0.0  ;;  %v609_v7 = vpop.f32.mrf.mxu1 }
 0x12f   : > { %1542 = vpow2.f32 %v744_v16  ;;  %v934_v43 = vmul.f32 1.442695, %v918_v23  ;;  %v857_v25 = vmul.f32 -0.08, %v713_v55  ;;  %v748_v10 = vmul.f32 1.442695, %v729_v32 }
 0x130   : > { %1544 = vpow2.f32 %v806_v21  ;;  %v728_v27 = vmul.f32 -2.0, %v712_v41  ;;  %v812_v31 = vmul.f32 1.442695, %v793_v36  ;;  %v792_v50 = vmul.f32 -0.5, %v712_v41 }
 0x131   : > { %1546 = vpow2.f32 %v808_v22  ;;  %v715_v51 = vmax.f32 %v699_v37, 0.0  ;;  %v682_v47 = vmul.f32 2.0, %v599_v33  ;;  %v936_v54 = vmul.f32 1.442695, %v919_v40 }
 0x132   : > { %1548 = vpow2.f32 %v870_v29  ;;  %v856_v60 = vmul.f32 -0.08, %v712_v41  ;;  %v876_v35 = vmul.f32 1.442695, %v857_v25  ;;  %v921_v62 = vmul.f32 -0.02, %v713_v55 }
 0x133   : > { %1550 = vpow2.f32 %v872_v39  ;;  %v920_v63 = vmul.f32 -0.02, %v712_v41  ;;  %v746_v0 = vmul.f32 1.442695, %v728_v27  ;;  %v731_v2 = vmul.f32 -2.0, %v715_v51 }
 0x134   : > { %1552 = vpow2.f32 %v934_v43  ;;  %v698_v42 = vsub.f32 %v666_v34, %v682_v47  ;;  %v810_v9 = vmul.f32 1.442695, %v792_v50  ;;  %v795_v14 = vmul.f32 -0.5, %v715_v51 }
 0x135   : > { %1554 = vpow2.f32 %v748_v10  ;;  %v685_v16 = vmul.f32 2.0, %v1452_v46  ;;  %v874_v21 = vmul.f32 1.442695, %v856_v60  ;;  %v859_v8 = vmul.f32 -0.08, %v715_v51  ;;  %v1455_v46 = vpop.f32.mrf.mxu1 }
 0x136   : > { %1556 = vpow2.f32 %v812_v31  ;;  %v714_v22 = vmax.f32 %v698_v42, 0.0  ;;  %v938_v49 = vmul.f32 1.442695, %v920_v63  ;;  %v684_v20 = vmul.f32 2.0, %v609_v7 }
 0x137   : > { %1558 = vpow2.f32 %v936_v54  ;;  %v701_v23 = vsub.f32 %v669_v38, %v685_v16  ;;  %v752_v55 = vmul.f32 1.442695, %v731_v2  ;;  %v2215_v32 = vadd.f32 %v2155_v19, %v2129_v59 }
 0x138   : > { %1560 = vpow2.f32 %v876_v35  ;;  %v730_v29 = vmul.f32 -2.0, %v714_v22  ;;  %v816_v34 = vmul.f32 1.442695, %v795_v14  ;;  %v794_v36 = vmul.f32 -0.5, %v714_v22 }
 0x139   : > { %1562 = vpow2.f32 %v746_v0  ;;  %v717_v37 = vmax.f32 %v701_v23, 0.0  ;;  %v940_v40 = vmul.f32 1.442695, %v921_v62  ;;  %v880_v41 = vmul.f32 1.442695, %v859_v8 }
 0x13a   : > { %1564 = vpow2.f32 %v810_v9  ;;  %v858_v43 = vmul.f32 -0.08, %v714_v22  ;;  %v750_v38 = vmul.f32 1.442695, %v730_v29  ;;  %v922_v10 = vmul.f32 -0.02, %v714_v22 }
 0x13b   : > { %v1541_v33 = vpop.eup %1540  ;;  %1566 = vpow2.f32 %v874_v21  ;;  %v700_v27 = vsub.f32 %v2203_v44, %v684_v20  ;;  %v733_v50 = vmul.f32 -2.0, %v717_v37  ;;  %v797_v47 = vmul.f32 -0.5, %v717_v37  ;;  %v619_v20 = vpop.f32.mrf.mxu1 }
 0x13c   : > { %v1543_v39 = vpop.eup %1542  ;;  %1568 = vpow2.f32 %v938_v49  ;;  %v923_v35 = vmul.f32 -0.02, %v715_v51  ;;  %v814_v62 = vmul.f32 1.442695, %v794_v36  ;;  %v878_v0 = vmul.f32 1.442695, %v858_v43 }
 0x13d   : > { %v1545_v25 = vpop.eup %1544  ;;  %1570 = vpow2.f32 %v752_v55  ;;  %v687_v2 = vmul.f32 2.0, %v1455_v46  ;;  %v942_v7 = vmul.f32 1.442695, %v922_v10  ;;  %v861_v9 = vmul.f32 -0.08, %v717_v37 }
 0x13e   : > { %v1547_v31 = vpop.eup %1546  ;;  %v838_v59 = vadd.f32 %v1545_v25, %v1541_v33  ;;  %1572 = vpow2.f32 %v816_v34  ;;  %v716_v44 = vmax.f32 %v700_v27, 0.0  ;;  %v756_v16 = vmul.f32 1.442695, %v733_v50 }
 0x13f   : > { %v1549_v54 = vpop.eup %1548  ;;  %v839_v60 = vadd.f32 %v1547_v31, %v1543_v39  ;;  %1574 = vpow2.f32 %v940_v40  ;;  %v820_v21 = vmul.f32 1.442695, %v797_v47  ;;  %v925_v8 = vmul.f32 -0.02, %v717_v37 }
 0x140   : > { %v902_v63 = vadd.f32 %v1549_v54, %v838_v59  ;;  %v1551_v42 = vpop.eup %1550  ;;  %1576 = vpow2.f32 %v880_v41  ;;  %v732_v23 = vmul.f32 -2.0, %v716_v44  ;;  %v796_v51 = vmul.f32 -0.5, %v716_v44  ;;  %v1458_v54 = vpop.f32.mrf.mxu1 }
 0x141   : > { %v1553_v14 = vpop.eup %1552  ;;  %1578 = vpow2.f32 %v750_v38  ;;  %v903_v49 = vadd.f32 %v1551_v42, %v839_v60  ;;  %v944_v33 = vmul.f32 1.442695, %v923_v35  ;;  %v703_v34 = vsub.f32 %v2207_v48, %v687_v2 }
 0x142   : > { %v1555_v22 = vpop.eup %1554  ;;  %1580 = vpow2.f32 %v814_v62  ;;  %v966_v29 = vadd.f32 %v1553_v14, %v902_v63  ;;  %v884_v40 = vmul.f32 1.442695, %v861_v9  ;;  %v860_v41 = vmul.f32 -0.08, %v716_v44 }
 0x143   : > { %v1557_v55 = vpop.eup %1556  ;;  %1582 = vpow2.f32 %v878_v0  ;;  %v754_v37 = vmul.f32 1.442695, %v732_v23  ;;  %v686_v25 = vmul.f32 2.0, %v619_v20  ;;  %v2221_v38 = vadd.f32 %v2155_v19, %v2136_v1 }
 0x144   : > { %v1559_v36 = vpop.eup %1558  ;;  %v841_v39 = vadd.f32 %v1557_v55, %v1555_v22  ;;  %1584 = vpow2.f32 %v942_v7  ;;  %v948_v46 = vmul.f32 1.442695, %v925_v8  ;;  %v818_v31 = vmul.f32 1.442695, %v796_v51 }
 0x145   : > { %v1561_v43 = vpop.eup %1560  ;;  %1586 = vpow2.f32 %v756_v16  ;;  %v967_v27 = vadd.f32 %v1559_v36, %v903_v49  ;;  %v982_v48 = vmul.f32 0.25, %v966_v29  ;;  %v924_v50 = vmul.f32 -0.02, %v716_v44 }
 0x146   : > { %v1563_v10 = vpop.eup %1562  ;;  %1588 = vpow2.f32 %v820_v21  ;;  %v719_v47 = vmax.f32 %v703_v34, 0.0  ;;  %v905_v35 = vadd.f32 %v1561_v43, %v841_v39  ;;  %v882_v63 = vmul.f32 1.442695, %v860_v41 }
 0x147   : > { %v1565_v59 = vpop.eup %1564  ;;  %1590 = vpow2.f32 %v944_v33  ;;  %v702_v42 = vsub.f32 %v2211_v61, %v686_v25  ;;  %v983_v9 = vmul.f32 0.25, %v967_v27  ;;  %v689_v16 = vmul.f32 2.0, %v1458_v54 }
 0x148   : > { %v1567_v60 = vpop.eup %1566  ;;  %v840_v62 = vadd.f32 %v1565_v59, %v1563_v10  ;;  %1592 = vpow2.f32 %v884_v40  ;;  %v735_v1 = vmul.f32 -2.0, %v719_v47  ;;  %v799_v2 = vmul.f32 -0.5, %v719_v47 }
 0x149   : > { %v1569_v0 = vpop.eup %1568  ;;  %1594 = vpow2.f32 %v754_v37  ;;  %v946_v44 = vmul.f32 1.442695, %v924_v50  ;;  %v863_v51 = vmul.f32 -0.08, %v719_v47  ;;  %v2226_v20 = vadd.f32 %v2155_v19, %v2153_v17 }
 0x14a   : > { %v1571_v7 = vpop.eup %1570  ;;  %v904_v14 = vadd.f32 %v1567_v60, %v840_v62  ;;  %1596 = vpow2.f32 %v818_v31  ;;  %v760_v8 = vmul.f32 1.442695, %v735_v1  ;;  %v824_v22 = vmul.f32 1.442695, %v799_v2 }
 0x14b   : > { %v1573_v21 = vpop.eup %1572  ;;  %1598 = vpow2.f32 %v948_v46  ;;  %v1106_v61 = vmul.f32 %v2121_v53, %v982_v48  ;;  %v718_v33 = vmax.f32 %v702_v42, 0.0  ;;  %v1107_v36 = vmul.f32 %v2125_v56, %v983_v9 }
 0x14c   : > { %v1575_v49 = vpop.eup %1574  ;;  %v968_v23 = vadd.f32 %v1569_v0, %v904_v14  ;;  %1600 = vpow2.f32 %v882_v63  ;;  %v843_v40 = vadd.f32 %v1573_v21, %v1571_v7  ;;  %v705_v25 = vsub.f32 %v2215_v32, %v689_v16  ;;  %v629_v0 = vpop.f32.mrf.mxu1 }
 0x14d   : > { %v1577_v55 = vpop.eup %1576  ;;  %v969_v29 = vadd.f32 %v1575_v49, %v905_v35  ;;  %1602 = vpow2.f32 %v760_v8  ;;  %v734_v43 = vmul.f32 -2.0, %v718_v33  ;;  %v798_v37 = vmul.f32 -0.5, %v718_v33 }
 0x14e   : > { %v1579_v34 = vpop.eup %1578  ;;  %v984_v39 = vmul.f32 0.25, %v968_v23  ;;  %1604 = vpow2.f32 %v824_v22  ;;  %v888_v27 = vmul.f32 1.442695, %v863_v51  ;;  %v927_v46 = vmul.f32 -0.02, %v719_v47 }
 0x14f   : > { %v1581_v41 = vpop.eup %1580  ;;  %1606 = vpow2.f32 %v946_v44  ;;  %v862_v53 = vmul.f32 -0.08, %v718_v33  ;;  %v1122_v59 = vmul.f32 %v1106_v61, %v2141_v5  ;;  %v985_v48 = vmul.f32 0.25, %v969_v29 }
 0x150   : > { %v1583_v17 = vpop.eup %1582  ;;  %v842_v10 = vadd.f32 %v1581_v41, %v1579_v34  ;;  %v758_v50 = vmul.f32 1.442695, %v734_v43  ;;  %v822_v56 = vmul.f32 1.442695, %v798_v37  ;;  %v1123_v60 = vmul.f32 %v1107_v36, %v2141_v5 }
 0x151   : > { %v1585_v31 = vpop.eup %1584  ;;  %v1108_v35 = vmul.f32 %v2146_v12, %v984_v39  ;;  %v907_v62 = vadd.f32 %v1577_v55, %v843_v40  ;;  %v886_v1 = vmul.f32 1.442695, %v862_v53  ;;  %v926_v2 = vmul.f32 -0.02, %v718_v33  ;;  %v1461_v55 = vpop.f32.mrf.mxu1 }
 0x152   : > { %v1587_v54 = vpop.eup %1586  ;;  %v906_v63 = vadd.f32 %v1583_v17, %v842_v10  ;;  %1608 = vpow2.f32 %v758_v50  ;;  %v721_v47 = vmax.f32 %v705_v25, 0.0  ;;  %v952_v14 = vmul.f32 1.442695, %v927_v46 }
 0x153   : > { %v1589_v32 = vpop.eup %1588  ;;  %1610 = vpow2.f32 %v888_v27  ;;  %v1109_v21 = vmul.f32 %v2143_v6, %v985_v48  ;;  %v688_v8 = vmul.f32 2.0, %v629_v0  ;;  %v1138_v22 = vadd.f32 %v1123_v60, %v1122_v59 }
 0x154   : > { %v1591_v42 = vpop.eup %1590  ;;  %v970_v7 = vadd.f32 %v1585_v31, %v906_v63  ;;  %v845_v9 = vadd.f32 %v1589_v32, %v1587_v54  ;;  %1612 = vpow2.f32 %v822_v56  ;;  %v737_v44 = vmul.f32 -2.0, %v721_v47  ;;  %v639_v63 = vpop.f32.mrf.mxu1 }
 0x155   : > { %v1593_v16 = vpop.eup %1592  ;;  %v1124_v49 = vmul.f32 %v1108_v35, %v2141_v5  ;;  %v801_v51 = vmul.f32 -0.5, %v721_v47  ;;  %1614 = vpow2.f32 %v886_v1  ;;  %v950_v33 = vmul.f32 1.442695, %v926_v2 }
 0x156   : > { %v1595_v12 = vpop.eup %1594  ;;  %v986_v23 = vmul.f32 0.25, %v970_v7  ;;  %v909_v29 = vadd.f32 %v1593_v16, %v845_v9  ;;  %v865_v34 = vmul.f32 -0.08, %v721_v47  ;;  %v971_v39 = vadd.f32 %v1591_v42, %v907_v62 }
 0x157   : > { %v1597_v61 = vpop.eup %1596  ;;  %1616 = vpow2.f32 %v952_v14  ;;  %v764_v6 = vmul.f32 1.442695, %v737_v44  ;;  %v1125_v43 = vmul.f32 %v1109_v21, %v2141_v5  ;;  %v929_v37 = vmul.f32 -0.02, %v721_v47 }
 0x158   : > { %v1599_v36 = vpop.eup %1598  ;;  %v844_v40 = vadd.f32 %v1597_v61, %v1595_v12  ;;  %v704_v25 = vsub.f32 %v2221_v38, %v688_v8  ;;  %v691_v17 = vmul.f32 2.0, %v1461_v55  ;;  %v1139_v27 = vadd.f32 %v1138_v22, %v1124_v49 }
 0x159   : > { %v1601_v41 = vpop.eup %1600  ;;  %v1110_v46 = vmul.f32 %v2150_v15, %v986_v23  ;;  %v828_v31 = vmul.f32 1.442695, %v801_v51  ;;  %v973_v48 = vadd.f32 %v1599_v36, %v909_v29  ;;  %1618 = vpow2.f32 %v950_v33 }
 0x15a   : > { %v1603_v10 = vpop.eup %1602  ;;  %v908_v53 = vadd.f32 %v1601_v41, %v844_v40  ;;  %v892_v50 = vmul.f32 1.442695, %v865_v34  ;;  %v720_v56 = vmax.f32 %v704_v25, 0.0  ;;  %v987_v60 = vmul.f32 0.25, %v971_v39 }
 0x15b   : > { %v1605_v59 = vpop.eup %1604  ;;  %1620 = vpow2.f32 %v764_v6  ;;  %v956_v35 = vmul.f32 1.442695, %v929_v37  ;;  %v707_v62 = vsub.f32 %v2226_v20, %v691_v17  ;;  %v1126_v15 = vmul.f32 %v1110_v46, %v2141_v5  ;;  %v1464_v20 = vpop.f32.mrf.mxu1 }
 0x15c   : > { %v1607_v54 = vpop.eup %1606  ;;  %v736_v0 = vmul.f32 -2.0, %v720_v56  ;;  %v800_v32 = vmul.f32 -0.5, %v720_v56  ;;  %v864_v1 = vmul.f32 -0.08, %v720_v56  ;;  %v1140_v2 = vadd.f32 %v1139_v27, %v1125_v43 }
 0x15d   : > { %v972_v38 = vadd.f32 %v1607_v54, %v908_v53  ;;  %v847_v47 = vadd.f32 %v1605_v59, %v1603_v10  ;;  %1622 = vpow2.f32 %v828_v31  ;;  %v989_v42 = vmul.f32 0.25, %v973_v48  ;;  %v649_v41 = vpop.f32.mrf.mxu1 }
 0x15e   : > { %1624 = vpow2.f32 %v892_v50  ;;  %v762_v7 = vmul.f32 1.442695, %v736_v0  ;;  %v826_v9 = vmul.f32 1.442695, %v800_v32  ;;  %v890_v16 = vmul.f32 1.442695, %v864_v1 }
 0x15f   : > { %v1609_v14 = vpop.eup %1608  ;;  %1626 = vpow2.f32 %v956_v35  ;;  %v928_v21 = vmul.f32 -0.02, %v720_v56  ;;  %v723_v44 = vmax.f32 %v707_v62, 0.0  ;;  %v1111_v12 = vmul.f32 %v2148_v13, %v987_v60 }
 0x160   : > { %v1611_v8 = vpop.eup %1610  ;;  %v988_v22 = vmul.f32 0.25, %v972_v38  ;;  %1628 = vpow2.f32 %v762_v7  ;;  %v674_v49 = vadd.f32 %v2155_v19, %v2159_v30  ;;  %v690_v61 = vmul.f32 2.0, %v639_v63 }
 0x161   : > { %v1613_v23 = vpop.eup %1612  ;;  %v911_v51 = vadd.f32 %v1611_v8, %v847_v47  ;;  %1630 = vpow2.f32 %v826_v9  ;;  %v954_v55 = vmul.f32 1.442695, %v928_v21  ;;  %v739_v33 = vmul.f32 -2.0, %v723_v44 }
 0x162   : > { %v846_v29 = vadd.f32 %v1613_v23, %v1609_v14  ;;  %v803_v34 = vmul.f32 -0.5, %v723_v44  ;;  %v693_v36 = vmul.f32 2.0, %v1464_v20  ;;  %v1615_v39 = vpop.eup %1614  ;;  %v1141_v40 = vadd.f32 %v1140_v2, %v1126_v15 }
 0x163   : > { %v1113_v6 = vmul.f32 %v2171_v45, %v989_v42  ;;  %1632 = vpow2.f32 %v890_v16  ;;  %v867_v13 = vmul.f32 -0.08, %v723_v44  ;;  %v768_v25 = vmul.f32 1.442695, %v739_v33 }
 0x164   : > { %v1617_v43 = vpop.eup %1616  ;;  %v910_v37 = vadd.f32 %v1615_v39, %v846_v29  ;;  %v832_v19 = vmul.f32 1.442695, %v803_v34  ;;  %v931_v30 = vmul.f32 -0.02, %v723_v44  ;;  %v1112_v17 = vmul.f32 %v2174_v18, %v988_v22 }
 0x165   : > { %v975_v10 = vadd.f32 %v1617_v43, %v911_v51  ;;  %1634 = vpow2.f32 %v954_v55  ;;  %v706_v27 = vsub.f32 %v674_v49, %v690_v61  ;;  %v1127_v46 = vmul.f32 %v1111_v12, %v2141_v5 }
 0x166   : > { %1636 = vpow2.f32 %v768_v25  ;;  %v709_v53 = vsub.f32 %v2190_v4, %v693_v36  ;;  %v692_v31 = vmul.f32 2.0, %v649_v41  ;;  %v1619_v45 = vpop.eup %1618  ;;  %v2249_v59 = vmul.f32 %v1113_v6, %v2141_v5 }
 0x167   : > { %1638 = vpow2.f32 %v832_v19  ;;  %v896_v48 = vmul.f32 1.442695, %v867_v13  ;;  %v722_v50 = vmax.f32 %v706_v27, 0.0  ;;  %v1142_v54 = vadd.f32 %v1141_v40, %v1127_v46 }
 0x168   : > { %v1621_v56 = vpop.eup %1620  ;;  %v974_v60 = vadd.f32 %v1619_v45, %v910_v37  ;;  %v960_v18 = vmul.f32 1.442695, %v931_v30  ;;  %v725_v35 = vmax.f32 %v709_v53, 0.0  ;;  %v1128_v62 = vmul.f32 %v1112_v17, %v2141_v5 }
 0x169   : > { %v991_v63 = vmul.f32 0.25, %v975_v10  ;;  %v738_v38 = vmul.f32 -2.0, %v722_v50  ;;  %v802_v0 = vmul.f32 -0.5, %v722_v50  ;;  %v866_v4 = vmul.f32 -0.08, %v722_v50 }
 0x16a   : > { %v1623_v32 = vpop.eup %1622  ;;  %v930_v1 = vmul.f32 -0.02, %v722_v50  ;;  %v741_v15 = vmul.f32 -2.0, %v725_v35  ;;  %v708_v2 = vsub.f32 %v2193_v24, %v692_v31  ;;  %1640 = vpow2.f32 %v896_v48 }
 0x16b   : > { %v1625_v47 = vpop.eup %1624  ;;  %v766_v42 = vmul.f32 1.442695, %v738_v38  ;;  %v830_v7 = vmul.f32 1.442695, %v802_v0  ;;  %v805_v9 = vmul.f32 -0.5, %v725_v35  ;;  %v990_v16 = vmul.f32 0.25, %v974_v60 }
 0x16c   : > { %v1627_v14 = vpop.eup %1626  ;;  %1642 = vpow2.f32 %v960_v18  ;;  %v894_v21 = vmul.f32 1.442695, %v866_v4  ;;  %v958_v44 = vmul.f32 1.442695, %v930_v1  ;;  %v849_v8 = vadd.f32 %v1623_v32, %v1621_v56 }
 0x16d   : > { %v1629_v20 = vpop.eup %1628  ;;  %1644 = vpow2.f32 %v766_v42  ;;  %v772_v12 = vmul.f32 1.442695, %v741_v15  ;;  %v869_v22 = vmul.f32 -0.08, %v725_v35  ;;  %v836_v24 = vmul.f32 1.442695, %v805_v9 }
 0x16e   : > { %v1631_v49 = vpop.eup %1630  ;;  %1646 = vpow2.f32 %v830_v7  ;;  %v933_v23 = vmul.f32 -0.02, %v725_v35  ;;  %v724_v51 = vmax.f32 %v708_v2, 0.0  ;;  %v1143_v55 = vadd.f32 %v1142_v54, %v1128_v62 }
 0x16f   : > { %v848_v61 = vadd.f32 %v1631_v49, %v1629_v20  ;;  %1648 = vpow2.f32 %v894_v21  ;;  %v900_v29 = vmul.f32 1.442695, %v869_v22  ;;  %v1114_v34 = vmul.f32 %v2180_v52, %v990_v16 }
 0x170   : > { %v1633_v33 = vpop.eup %1632  ;;  %1650 = vpow2.f32 %v958_v44  ;;  %v964_v36 = vmul.f32 1.442695, %v933_v23  ;;  %v740_v39 = vmul.f32 -2.0, %v724_v51  ;;  %v913_v40 = vadd.f32 %v1625_v47, %v849_v8 }
 0x171   : > { %v912_v6 = vadd.f32 %v1633_v33, %v848_v61  ;;  %1652 = vpow2.f32 %v772_v12  ;;  %v804_v13 = vmul.f32 -0.5, %v724_v51  ;;  %v868_v37 = vmul.f32 -0.08, %v724_v51 }
 0x172   : > { %v1635_v41 = vpop.eup %1634  ;;  %1654 = vpow2.f32 %v836_v24  ;;  %v770_v43 = vmul.f32 1.442695, %v740_v39  ;;  %v932_v25 = vmul.f32 -0.02, %v724_v51  ;;  %v1012_v17 = vadd.s32 96, %v2086_v26 }
 0x173   : > { %v1637_v19 = vpop.eup %1636  ;;  %v976_v30 = vadd.f32 %v1635_v41, %v912_v6  ;;  %1656 = vpow2.f32 %v900_v29  ;;  %v834_v10 = vmul.f32 1.442695, %v804_v13  ;;  %v1130_v52 = vmul.f32 %v1114_v34, %v2141_v5 }
 0x174   : > { %v1639_v27 = vpop.eup %1638  ;;  %v1144_v46 = vadd.f32 %v1143_v55, %v2249_v59  ;;  %1658 = vpow2.f32 %v964_v36  ;;  %v898_v53 = vmul.f32 1.442695, %v868_v37  ;;  %v1115_v31 = vmul.f32 %v2177_v11, %v991_v63 }
 0x175   : > { %v992_v45 = vmul.f32 0.25, %v976_v30  ;;  %v1013_v48 = vadd.s32 104, %v2086_v26  ;;  %1660 = vpow2.f32 %v770_v43  ;;  %v977_v50 = vadd.f32 %v1627_v14, %v913_v40 }
 0x176   : > { %v851_v56 = vadd.f32 %v1639_v27, %v1637_v19  ;;  %1662 = vpow2.f32 %v834_v10  ;;  %v962_v54 = vmul.f32 1.442695, %v932_v25  ;;  %v1029_v60 = vadd.s32 %v2092_v28, %v1012_v17 }
 0x177   : > { %v1641_v18 = vpop.eup %1640  ;;  %v1145_v35 = vadd.f32 %v1144_v46, %v1130_v52  ;;  %v1081_v59 = vsel %vm1065_vm10, -0.010416667, %v1763_v3  ;;  %v1116_v11 = vmul.f32 %v2187_v57, %v992_v45  ;;  %1664 = vpow2.f32 %v898_v53 }
 0x178   : > { %v1030_v63 = vadd.s32 %v2092_v28, %v1013_v48  ;;  %v1015_v38 = vadd.s32 120, %v2086_v26  ;;  %v1131_v32 = vmul.f32 %v1115_v31, %v2141_v5  ;;  %v993_v4 = vmul.f32 0.25, %v977_v50 }
 0x179   : > { %v1643_v62 = vpop.eup %1642  ;;  %v915_v1 = vadd.f32 %v1641_v18, %v851_v56  ;;  %1666 = vpow2.f32 %v962_v54  ;;  %v1097_v2 = vsel %vm1049_vm11, 0.010416667, %v1081_v59  ;;  %vm1066_vm12 = vcmp.lt.s32.totalorder %v1029_v60, 192 }
 0x17a   : > { %v1645_v0 = vpop.eup %1644  ;;  %v1014_v47 = vadd.s32 112, %v2086_v26  ;;  %v1132_v42 = vmul.f32 %v1116_v11, %v2141_v5  ;;  %v1146_v7 = vadd.f32 %v1145_v35, %v1131_v32  ;;  %vm1067_vm13 = vcmp.lt.s32.totalorder %v1030_v63, 192  ;;  %v1153_v11 = vld [vmem:[#allocation2] sm:$0xff] }
 0x17b   : > { %v1647_v15 = vpop.eup %1646  ;;  %vm1050_vm14 = vcmp.lt.s32.totalorder %v1029_v60, 96  ;;  %v1032_v16 = vadd.s32 %v2092_v28, %v1015_v38  ;;  %v1117_v44 = vmul.f32 %v1097_v2, %v993_v4  ;;  %v979_v20 = vadd.f32 %v1643_v62, %v915_v1 }
 0x17c   : > { %v1649_v57 = vpop.eup %1648  ;;  %v850_v9 = vadd.f32 %v1647_v15, %v1645_v0  ;;  %v1082_v58 = vsel %vm1066_vm12, -0.010416667, %v1763_v3  ;;  %vm1051_vm15 = vcmp.lt.s32.totalorder %v1030_v63, 96  ;;  %v1031_v26 = vadd.s32 %v2092_v28, %v1014_v47 }
 0x17d   : > { %v1651_v14 = vpop.eup %1650  ;;  %v1147_v49 = vadd.f32 %v1146_v7, %v1132_v42  ;;  %v1083_v24 = vsel %vm1067_vm13, -0.010416667, %v1763_v3  ;;  %v1098_v61 = vsel %vm1050_vm14, 0.010416667, %v1082_v58  ;;  %vm1069_vm0 = vcmp.lt.s32.totalorder %v1032_v16, 192 }
 0x17e   : > { %v1653_v21 = vpop.eup %1652  ;;  %v914_v8 = vadd.f32 %v1649_v57, %v850_v9  ;;  %v1133_v33 = vmul.f32 %v1117_v44, %v2141_v5  ;;  %v995_v34 = vmul.f32 0.25, %v979_v20  ;;  %v1099_v6 = vsel %vm1051_vm15, 0.010416667, %v1083_v24 }
 0x17f   : > { %v1655_v12 = vpop.eup %1654  ;;  %vm1068_vm1 = vcmp.lt.s32.totalorder %v1031_v26, 192  ;;  %vm1053_vm2 = vcmp.lt.s32.totalorder %v1032_v16, 96  ;;  %v1085_v25 = vsel %vm1069_vm0, -0.010416667, %v1763_v3  ;;  %vm1052_vm3 = vcmp.lt.s32.totalorder %v1031_v26, 96 }
 0x180   : > { %v1657_v22 = vpop.eup %1656  ;;  %v978_v23 = vadd.f32 %v1651_v14, %v914_v8  ;;  %v853_v51 = vadd.f32 %v1655_v12, %v1653_v21  ;;  %v1148_v13 = vadd.f32 %v1147_v49, %v1133_v33  ;;  %v1119_v19 = vmul.f32 %v1099_v6, %v995_v34 }
 0x181   : > { %v1659_v55 = vpop.eup %1658  ;;  %v1084_v10 = vsel %vm1068_vm1, -0.010416667, %v1763_v3  ;;  %v1101_v31 = vsel %vm1053_vm2, 0.010416667, %v1085_v25 }
 0x182   : > { %v1661_v29 = vpop.eup %1660  ;;  %v994_v36 = vmul.f32 0.25, %v978_v23  ;;  %v917_v39 = vadd.f32 %v1657_v22, %v853_v51  ;;  %v1100_v45 = vsel %vm1052_vm3, 0.010416667, %v1084_v10  ;;  %v1135_v48 = vmul.f32 %v1119_v19, %v2141_v5 }
 0x183   : > { %v1663_v40 = vpop.eup %1662 }
 0x184   : > { %v1118_v28 = vmul.f32 %v1098_v61, %v994_v36  ;;  %v981_v41 = vadd.f32 %v1659_v55, %v917_v39  ;;  %v852_v43 = vadd.f32 %v1663_v40, %v1661_v29  ;;  %v1665_v37 = vpop.eup %1664 }
 0x186   : > { %v1134_v30 = vmul.f32 %v1118_v28, %v2141_v5  ;;  %v916_v17 = vadd.f32 %v1665_v37, %v852_v43  ;;  %v1667_v27 = vpop.eup %1666  ;;  %v997_v46 = vmul.f32 0.25, %v981_v41 }
 0x188   : > { %v1149_v52 = vadd.f32 %v1148_v13, %v1134_v30  ;;  %v980_v53 = vadd.f32 %v1667_v27, %v916_v17  ;;  %v1121_v56 = vmul.f32 %v1101_v31, %v997_v46 }
 0x18a   : > { %v996_v50 = vmul.f32 0.25, %v980_v53  ;;  %v1150_v60 = vadd.f32 %v1149_v52, %v1135_v48  ;;  %v1137_v35 = vmul.f32 %v1121_v56, %v2141_v5 }
 0x18c   : > { %v1120_v54 = vmul.f32 %v1100_v45, %v996_v50 }
 0x18e   : > { %v1136_v18 = vmul.f32 %v1120_v54, %v2141_v5 }
 0x190   : > { %v1151_v59 = vadd.f32 %v1150_v60, %v1136_v18 }
 0x192   : > { %v1152_v62 = vadd.f32 %v1151_v59, %v1137_v35  ;;  %1159 = sbr.rel (%p1320_p1) target bundleno = 415 (0x19f), region = 36 }
 0x194   : > { %v1154_v3 = vadd.f32 %v1153_v11, %v1152_v62 }
 0x196   : > { %1155 = vst [vmem:[#allocation2] sm:$0xff] %v1154_v3 }
 0x19d   : > { %v1160_v63 = vld [vmem:[#allocation2] sm:$0xff] }
 0x19e   : > { %1161 = vst [vmem:[%s165_s18] sm:$0xff] %v1160_v63 }
 0x19f PF: > { %s1174_s30 = scalar_lea.hbm %s2340_s2, %s1318_s23  ;;  %s1176_s3 = sshll.u32 %s165_s18, 4  ;;  %s1177_s3 = int_to_ptr.vmem [resolvable:$true] %s1176_s3 }
 0x1a0   : > { %s1163_s12 = scalar_lea.sflag [#allocation4], %s163_s26  ;;  %s1668_s4 = scalar_lea.vmem %s1177_s3, 128 }
 0x1a1   : > { %p1669_p2 = scmp.ne.s32.totalorder %s1177_s3, %s1668_s4  ;;  %s1766_s5 = smov [#allocation3]  }
 0x1a2   : > { %s1672_s6 = sshll.u32 %s1766_s5, 4  ;;  %s1673_s6 = int_to_ptr.vmem [resolvable:$false] %s1672_s6 }
 0x1a3   : > { %p1670_p4 = pnand %p1669_p2, %p1831_p3  ;;  %s1674_s13 = scalar_lea.vmem %s1673_s6, 256 }
 0x1a4   : > { %p1675_p6 = scmp.lt.s32.totalorder %s1177_s3, %s1673_s6  ;;  %p1676_p7 = scmp.lt.s32.totalorder %s1674_s13, %s1668_s4 }
 0x1a5   : > { %p1671_p5 = pneg %p1670_p4 }
 0x1a6   : > { %p1677_p8 = por %p1676_p7, %p1675_p6 }
 0x1a8   : > { %p1678_p10 = pnand %p1677_p8, %p1671_p5 }
 0x1aa   : > { %1681 = shalt.err (!%p1678_p10)
}
 0x1ab   : > { %s1682_s7 = scalar_lea.hbm %s1174_s30, 128  ;;  %s1686_s8 = scalar_lea.hbm %s2340_s2, 256 }
 0x1ac   : > { %p1683_p11 = scmp.ne.s32.totalorder %s1174_s30, %s1682_s7  ;;  %p1687_p0 = scmp.lt.s32.totalorder %s1174_s30, %s2340_s2 }
 0x1ad   : > { %p1688_p1 = scmp.lt.s32.totalorder %s1686_s8, %s1682_s7 }
 0x1ae   : > { %p1684_p12 = pnand %p1683_p11, %p1831_p3 }
 0x1af   : > { %p1689_p2 = por %p1688_p1, %p1687_p0 }
 0x1b0   : > { %p1685_p13 = pneg %p1684_p12 }
 0x1b2   : > { %p1690_p4 = pnand %p1689_p2, %p1685_p13 }
 0x1b4   : > { %1693 = shalt.err (!%p1690_p4)
}
 0x1b5   : > { %1465 = dma.vmem_to_hbm [thread:$0]  (%p1831_p3), %s1177_s3, 128, %s1174_s30, %s1163_s12  }
 0x1b6 PF: > { %p1471_p5 = scmp.ge.s32.totalorder %s1760_s16, 2  ;;  %s1188_s23 = sand.u32 1, %s1732_s9  }
 0x1b7   : > { %s1189_s24 = scalar_lea.sflag [#allocation4], %s1188_s23 }
 0x1b8   : > { %p1468_p6 = pnand %p1471_p5, %p1841_p9 }
 0x1ba   : > { %p1469_p7 = pneg %p1468_p6 }
 0x1bc   : > { %1727 = dma.done.wait (%p1469_p7), %s1189_s24, 128  }
 0x1bd   : > { %1729 = vsyncadd (%p1469_p7), %s1189_s24, 4294967168  ;;  %s15_s16 = sadd.s32 1, %s1760_s16   ;;  %s2343_s9 = smov %s1736_s10 }
 0x1be   : > { %p12_p8 = scmp.ge.s32.totalorder %s15_s16, 6   ;;  %s2344_s10 = smov %s1740_s11 }
 0x1bf   : > { %s2345_s11 = smov %s1849_s25  ;;  %s2346_s12 = smov %s1752_s14 }
 0x1c0   : > { %s2347_s13 = smov %s1756_s15  ;;  %s2348_s14 = smov %s2351_s19 }
 0x1c1   : > { %s2349_s15 = smov %s2355_s20  ;;  %14 = sbr.rel (!%p12_p8) target bundleno = 5 (0x5), region = 74 }
 0x1c6   :  { %1194 = vsyncpa [#allocation4], 1 }
 0x1c7   :  { %1196 = vsyncpa [#allocation4 + $0x1], 1 }

</bundles_post_ra>
